<compile_context>
chip_gen: v7x
topology: tpu7x:2x2x1
jax: 0.10.0
libtpu: 0.0.40
codegen_flags: <defaults>
</compile_context>

<pallas_src>
import functools
import numpy as np
import jax
import jax.numpy as jnp
from jax.experimental import pallas as pl
from jax.experimental.pallas import tpu as pltpu

SIGMA = 7.1e-07
F1 = 0.0528
F2 = 0.3391
FALPHA = 2.8647
NITER = 30
NC = 8        # stand-in denoiser width (real DRUNet: 64 ch, 4-scale U-Net)
NBLOCKS = 2   # stand-in denoiser depth

_FOURIER_ROW_TILE = 512          # (512, 128) f32 = 256 KiB per plane per block
_CONV_PIX_TILE = 2048            # lane-axis tile of the conv matmul
_VMEM_LIMIT = 48 * 1024 * 1024   # headroom below v7x's 64 MiB physical VMEM

_SMEM_SPEC = pl.BlockSpec(memory_space=pltpu.MemorySpace.SMEM)


# ----------------------------- Pallas kernels ------------------------------

def _fourier_update_kernel(alpha_ref, cr_ref, ci_ref, psq_ref, zr_ref, zi_ref,
                           or_ref, oi_ref):
    """IterationStep.iter in Fourier domain with hoisted invariants:
       x_fft = (cr + i*ci + alpha*(zr + i*zi)) / (psq + alpha)
       where cr/ci = Re/Im(conj(fpsf)*F(dirty)), psq = |fpsf|^2."""
    alpha = alpha_ref[0]
    inv_den = 1.0 / (psq_ref[...] + alpha)          # exact division on purpose
    or_ref[...] = (cr_ref[...] + alpha * zr_ref[...]) * inv_den
    oi_ref[...] = (ci_ref[...] + alpha * zi_ref[...]) * inv_den


def _conv_matmul_kernel(w_ref, a_ref, o_ref, *, relu):
    """3x3 conv as im2col matmul with the pixel axis on lanes:
       o (Cout, TN) = w (Cout, Cin*9) @ a (Cin*9, TN); optional fused ReLU."""
    acc = jnp.dot(w_ref[...], a_ref[...], preferred_element_type=jnp.float32)
    if relu:
        acc = jnp.maximum(acc, 0.0)
    o_ref[...] = acc


# ------------------------------- wrappers -----------------------------------

def fourier_update(alpha, cr, ci, psq, zr, zi):
    """Gridded, pipelined elementwise Fourier-domain update.
    All inputs are (rows, lanes) float32 planes; alpha is a traced scalar."""
    rows, lanes = cr.shape
    tr = rows if rows <= _FOURIER_ROW_TILE else _FOURIER_ROW_TILE
    grid = (pl.cdiv(rows, tr),)
    vspec = pl.BlockSpec((tr, lanes), lambda i: (i, 0))
    alpha_arr = jnp.reshape(alpha, (1,)).astype(jnp.float32)

    out_r, out_i = pl.pallas_call(
        _fourier_update_kernel,
        out_shape=(jax.ShapeDtypeStruct((rows, lanes), jnp.float32),
                   jax.ShapeDtypeStruct((rows, lanes), jnp.float32)),
        grid=grid,
        in_specs=[_SMEM_SPEC, vspec, vspec, vspec, vspec, vspec],
        out_specs=(vspec, vspec),
        compiler_params=pltpu.CompilerParams(
            dimension_semantics=("parallel",),
            vmem_limit_bytes=_VMEM_LIMIT),
    )(alpha_arr, cr, ci, psq, zr, zi)
    return out_r, out_i


def conv3x3_packed(x_nchw, wmat, relu=False):
    """3x3, stride 1, SAME padding, bias-free conv (DRUNet convention).
    wmat: prepacked (Cout, Cin*9) bf16 weight matrix.
    Output pixel axis is the lane axis -> lane-dense stores, no transposes."""
    B, Cin, H, W = x_nchw.shape
    Cout, K = wmat.shape
    npix = H * W

    # im2col glue in plain JAX: (B, Cin*9, H, W), channel-major patch ordering
    # (matches w_oihw.reshape(Cout, Cin*9)).
    # TODO(synk): fusing the whole denoiser into a single pallas_call (3x3
    # gathers via shifted slices in VMEM) would eliminate this 9x im2col
    # expansion; kept as XLA glue here.
    patches = jax.lax.conv_general_dilated_patches(
        x_nchw, filter_shape=(3, 3), window_strides=(1, 1), padding="SAME")
    a = patches.reshape(B, K, npix).astype(jnp.bfloat16)

    tn = npix if npix <= _CONV_PIX_TILE else _CONV_PIX_TILE
    grid = (B, pl.cdiv(npix, tn))

    out = pl.pallas_call(
        functools.partial(_conv_matmul_kernel, relu=relu),
        out_shape=jax.ShapeDtypeStruct((B, Cout, npix), jnp.float32),
        grid=grid,
        in_specs=[
            pl.BlockSpec((Cout, K), lambda b, j: (0, 0)),       # weights (tiny)
            pl.BlockSpec((None, K, tn), lambda b, j: (b, 0, j)),  # A[b] tile
        ],
        out_specs=pl.BlockSpec((None, Cout, tn), lambda b, j: (b, 0, j)),
        compiler_params=pltpu.CompilerParams(
            dimension_semantics=("parallel", "parallel"),
            vmem_limit_bytes=_VMEM_LIMIT),
    )(wmat, a)

    return out.reshape(B, Cout, H, W)


# ------------------------- denoiser (DRUNet stand-in) -----------------------
# TODO(synk): the pretrained DRUNet (downloaded 64-ch, 4-scale U-Net weights)
# has no in-script equivalent; it is replaced by a deterministic DRUNet-style
# residual conv denoiser ([x, sigma-map] input, bias-free 3x3 convs).

def make_denoiser_params(key, nc=NC, nblocks=NBLOCKS):
    def conv_w(k, cout, cin):
        scale = 0.1 / np.sqrt(cin * 9)
        return scale * jax.random.normal(k, (cout, cin, 3, 3), jnp.float32)

    keys = jax.random.split(key, 2 + 2 * nblocks)
    return {
        "head": conv_w(keys[0], nc, 2),            # input = concat(x, sigma map)
        "blocks": [(conv_w(keys[2 + 2 * i], nc, nc),
                    conv_w(keys[3 + 2 * i], nc, nc)) for i in range(nblocks)],
        "tail": conv_w(keys[1], 1, nc),
    }


def pack_denoiser_weights(params):
    """Hoisted (out-of-scan) weight packing: OIHW -> (Cout, Cin*9) bf16."""
    def pack(w):
        return w.reshape(w.shape[0], -1).astype(jnp.bfloat16)
    return {
        "head": pack(params["head"]),
        "blocks": [(pack(w1), pack(w2)) for w1, w2 in params["blocks"]],
        "tail": pack(params["tail"]),
    }


def denoiser_apply(wpack, x, sigma):
    B, _, H, W = x.shape
    noise_map = jnp.full((B, 1, H, W), sigma, dtype=jnp.float32)
    h = conv3x3_packed(jnp.concatenate([x, noise_map], axis=1), wpack["head"])
    for w1, w2 in wpack["blocks"]:
        r = conv3x3_packed(h, w1, relu=True)
        r = conv3x3_packed(r, w2)
        h = h + r
    return conv3x3_packed(h, wpack["tail"])


# ---------------------------- unfolded algorithm ----------------------------

def make_schedules(niter=NITER, f1=F1, f2=F2, falpha=FALPHA, sigma=SIGMA):
    sigma_k = np.geomspace(f1 * sigma, f2 * sigma, niter)[::-1].copy()
    alpha_k = falpha * sigma ** 2 / sigma_k ** 2
    return jnp.asarray(alpha_k, jnp.float32), jnp.asarray(sigma_k, jnp.float32)


def unfolded_forward(params, im, alpha_k, sigma_k):
    dirty = im[:, 0:1, :, :].astype(jnp.float32)           # im[:,0].unsqueeze(1)
    psf = im[:, 1:2, :, :].astype(jnp.float32)             # im[:,1].unsqueeze(1)
    fpsf = jnp.fft.fft2(jnp.fft.ifftshift(psf, axes=(-2, -1)))
    fdirty = jnp.fft.fft2(dirty)

    shape = fpsf.shape
    total = int(np.prod(shape))
    lanes = 128 if total % 128 == 0 else shape[-1]
    rows = total // lanes

    def plane(v):
        return v.astype(jnp.float32).reshape(rows, lanes)

    # Loop-invariant Fourier terms, computed once (hoisted out of the scan).
    cross = jnp.conj(fpsf) * fdirty
    cr = plane(jnp.real(cross))
    ci = plane(jnp.imag(cross))
    psq = plane(jnp.real(fpsf * jnp.conj(fpsf)))

    wpack = pack_denoiser_weights(params)                  # hoisted, bf16

    def body(z, sched):
        alpha, sigma = sched
        fz = jnp.fft.fft2(z)
        zr = plane(jnp.real(fz))
        zi = plane(jnp.imag(fz))
        xr, xi = fourier_update(alpha, cr, ci, psq, zr, zi)
        x_fft = jax.lax.complex(xr, xi).reshape(shape)
        x = jnp.real(jnp.fft.ifft2(x_fft)).astype(jnp.float32)
        z_new = denoiser_apply(wpack, x, sigma)
        return z_new, None

    z_final, _ = jax.lax.scan(body, dirty, (alpha_k, sigma_k))
    return z_final


# ---------------------------------- main -------------------------------------

if __name__ == "__main__":
    key = jax.random.PRNGKey(0)
    im = jax.random.normal(key, (2, 2, 16, 16), jnp.float32)   # [B, 2(dirty,psf), H, W]
    params = make_denoiser_params(jax.random.PRNGKey(42))
    alpha_k, sigma_k = make_schedules()

    fwd = jax.jit(unfolded_forward)
    out = fwd(params, im, alpha_k, sigma_k)
    jax.block_until_ready(out)

    assert out.shape == (2, 1, 16, 16), out.shape
    assert out.dtype == jnp.float32
    print("KERNEL_OK")
</pallas_src>

<mosaic_0001>
module attributes {stable_mosaic.version = 11 : i64} {
  func.func @_fourier_update_kernel(%arg0: i32, %arg1: memref<1xf32, #tpu.memory_space<smem>>, %arg2: memref<4x128xf32, #tpu.memory_space<vmem>>, %arg3: memref<4x128xf32, #tpu.memory_space<vmem>>, %arg4: memref<4x128xf32, #tpu.memory_space<vmem>>, %arg5: memref<4x128xf32, #tpu.memory_space<vmem>>, %arg6: memref<4x128xf32, #tpu.memory_space<vmem>>, %arg7: memref<4x128xf32, #tpu.memory_space<vmem>>, %arg8: memref<4x128xf32, #tpu.memory_space<vmem>>) attributes {dimension_semantics = [#tpu.dimension_semantics<parallel>], iteration_bounds = array<i64: 1>, scalar_prefetch = 0 : i64, scratch_operands = 0 : i64, tpu.core_type = #tpu.core_type<tc>, window_params = [{transform_indices = @transform_0, window_bounds = array<i64: 1>}, {transform_indices = @transform_1, window_bounds = array<i64: 4, 128>}, {transform_indices = @transform_2, window_bounds = array<i64: 4, 128>}, {transform_indices = @transform_3, window_bounds = array<i64: 4, 128>}, {transform_indices = @transform_4, window_bounds = array<i64: 4, 128>}, {transform_indices = @transform_5, window_bounds = array<i64: 4, 128>}, {transform_indices = @transform_6, window_bounds = array<i64: 4, 128>}, {transform_indices = @transform_7, window_bounds = array<i64: 4, 128>}]} {
    %c0 = arith.constant 0 : index
    %0 = memref.load %arg1[%c0] : memref<1xf32, #tpu.memory_space<smem>>
    %c0_0 = arith.constant 0 : index
    %c0_1 = arith.constant 0 : index
    %1 = vector.load %arg4[%c0_0, %c0_1] : memref<4x128xf32, #tpu.memory_space<vmem>>, vector<4x128xf32>
    %2 = vector.broadcast %0 : f32 to vector<4x128xf32>
    %3 = arith.addf %1, %2 : vector<4x128xf32>
    %cst = arith.constant 1.000000e+00 : f32
    %4 = vector.broadcast %cst : f32 to vector<4x128xf32>
    %5 = arith.divf %4, %3 : vector<4x128xf32>
    %c0_2 = arith.constant 0 : index
    %c0_3 = arith.constant 0 : index
    %6 = vector.load %arg2[%c0_2, %c0_3] : memref<4x128xf32, #tpu.memory_space<vmem>>, vector<4x128xf32>
    %c0_4 = arith.constant 0 : index
    %c0_5 = arith.constant 0 : index
    %7 = vector.load %arg5[%c0_4, %c0_5] : memref<4x128xf32, #tpu.memory_space<vmem>>, vector<4x128xf32>
    %8 = vector.broadcast %0 : f32 to vector<4x128xf32>
    %9 = arith.mulf %8, %7 : vector<4x128xf32>
    %10 = arith.addf %6, %9 : vector<4x128xf32>
    %11 = arith.mulf %10, %5 : vector<4x128xf32>
    %c0_6 = arith.constant 0 : index
    %c0_7 = arith.constant 0 : index
    %12 = vector.load %arg7[%c0_6, %c0_7] : memref<4x128xf32, #tpu.memory_space<vmem>>, vector<4x128xf32>
    tpu.vector_store %arg7[%c0_6, %c0_7], %11 {strides = array<i32>} : memref<4x128xf32, #tpu.memory_space<vmem>>, vector<4x128xf32>,
    %c0_8 = arith.constant 0 : index
    %c0_9 = arith.constant 0 : index
    %13 = vector.load %arg3[%c0_8, %c0_9] : memref<4x128xf32, #tpu.memory_space<vmem>>, vector<4x128xf32>
    %c0_10 = arith.constant 0 : index
    %c0_11 = arith.constant 0 : index
    %14 = vector.load %arg6[%c0_10, %c0_11] : memref<4x128xf32, #tpu.memory_space<vmem>>, vector<4x128xf32>
    %15 = vector.broadcast %0 : f32 to vector<4x128xf32>
    %16 = arith.mulf %15, %14 : vector<4x128xf32>
    %17 = arith.addf %13, %16 : vector<4x128xf32>
    %18 = arith.mulf %17, %5 : vector<4x128xf32>
    %c0_12 = arith.constant 0 : index
    %c0_13 = arith.constant 0 : index
    %19 = vector.load %arg8[%c0_12, %c0_13] : memref<4x128xf32, #tpu.memory_space<vmem>>, vector<4x128xf32>
    tpu.vector_store %arg8[%c0_12, %c0_13], %18 {strides = array<i32>} : memref<4x128xf32, #tpu.memory_space<vmem>>, vector<4x128xf32>,
    return
  }
  func.func @transform_0(%arg0: i32) -> i32 {
    %c0_i32 = arith.constant 0 : i32
    %c0_i32_0 = arith.constant 0 : i32
    return %c0_i32 : i32
  }
  func.func @transform_1(%arg0: i32) -> (i32, i32) {
    %c0_i32 = arith.constant 0 : i32
    %c0_i32_0 = arith.constant 0 : i32
    return %arg0, %c0_i32 : i32, i32
  }
  func.func @transform_2(%arg0: i32) -> (i32, i32) {
    %c0_i32 = arith.constant 0 : i32
    %c0_i32_0 = arith.constant 0 : i32
    return %arg0, %c0_i32 : i32, i32
  }
  func.func @transform_3(%arg0: i32) -> (i32, i32) {
    %c0_i32 = arith.constant 0 : i32
    %c0_i32_0 = arith.constant 0 : i32
    return %arg0, %c0_i32 : i32, i32
  }
  func.func @transform_4(%arg0: i32) -> (i32, i32) {
    %c0_i32 = arith.constant 0 : i32
    %c0_i32_0 = arith.constant 0 : i32
    return %arg0, %c0_i32 : i32, i32
  }
  func.func @transform_5(%arg0: i32) -> (i32, i32) {
    %c0_i32 = arith.constant 0 : i32
    %c0_i32_0 = arith.constant 0 : i32
    return %arg0, %c0_i32 : i32, i32
  }
  func.func @transform_6(%arg0: i32) -> (i32, i32) {
    %c0_i32 = arith.constant 0 : i32
    %c0_i32_0 = arith.constant 0 : i32
    return %arg0, %c0_i32 : i32, i32
  }
  func.func @transform_7(%arg0: i32) -> (i32, i32) {
    %c0_i32 = arith.constant 0 : i32
    %c0_i32_0 = arith.constant 0 : i32
    return %arg0, %c0_i32 : i32, i32
  }
}

module attributes {stable_mosaic.version = 11 : i64} {
  func.func @_conv_matmul_kernel(%arg0: i32, %arg1: i32, %arg2: memref<8x18xbf16, #tpu.memory_space<vmem>>, %arg3: memref<1x18x256xbf16, #tpu.memory_space<vmem>>, %arg4: memref<1x8x256xf32, #tpu.memory_space<vmem>>) attributes {dimension_semantics = [#tpu.dimension_semantics<parallel>, #tpu.dimension_semantics<parallel>], iteration_bounds = array<i64: 2, 1>, scalar_prefetch = 0 : i64, scratch_operands = 0 : i64, tpu.core_type = #tpu.core_type<tc>, window_params = [{pipeline_mode = #tpu.pipeline_mode<synchronous>, transform_indices = @transform_0, window_bounds = array<i64: 8, 18>}, {transform_indices = @transform_1, window_bounds = array<i64: 1, 18, 256>}, {transform_indices = @transform_2, window_bounds = array<i64: 1, 8, 256>}]} {
    %c0 = arith.constant 0 : index
    %c0_0 = arith.constant 0 : index
    %0 = vector.load %arg2[%c0, %c0_0] : memref<8x18xbf16, #tpu.memory_space<vmem>>, vector<8x18xbf16>
    %c0_1 = arith.constant 0 : index
    %c0_2 = arith.constant 0 : index
    %c0_3 = arith.constant 0 : index
    %1 = vector.load %arg3[%c0_1, %c0_2, %c0_3] : memref<1x18x256xbf16, #tpu.memory_space<vmem>>, vector<1x18x256xbf16>
    %2 = vector.shape_cast %1 : vector<1x18x256xbf16> to vector<18x256xbf16>
    %cst = arith.constant dense<0.000000e+00> : vector<8x256xf32>
    %3 = tpu.matmul %0, %2, %cst {dimension_numbers = #tpu.dot_dimension_numbers<[1], [0], [0], [1], [0, 0, 1, 1], [], []>} : vector<8x18xbf16>, vector<18x256xbf16>, vector<8x256xf32> -> vector<8x256xf32>
    %c0_4 = arith.constant 0 : index
    %c0_5 = arith.constant 0 : index
    %c0_6 = arith.constant 0 : index
    %4 = vector.load %arg4[%c0_4, %c0_5, %c0_6] : memref<1x8x256xf32, #tpu.memory_space<vmem>>, vector<1x8x256xf32>
    %5 = vector.shape_cast %4 : vector<1x8x256xf32> to vector<8x256xf32>
    %6 = vector.shape_cast %3 : vector<8x256xf32> to vector<1x8x256xf32>
    tpu.vector_store %arg4[%c0_4, %c0_5, %c0_6], %6 {strides = array<i32>} : memref<1x8x256xf32, #tpu.memory_space<vmem>>, vector<1x8x256xf32>,
    return
  }
  func.func @transform_0(%arg0: i32, %arg1: i32) -> (i32, i32) {
    %c0_i32 = arith.constant 0 : i32
    %c0_i32_0 = arith.constant 0 : i32
    %c0_i32_1 = arith.constant 0 : i32
    return %c0_i32, %c0_i32_0 : i32, i32
  }
  func.func @transform_1(%arg0: i32, %arg1: i32) -> (i32, i32, i32) {
    %c0_i32 = arith.constant 0 : i32
    %c0_i32_0 = arith.constant 0 : i32
    return %arg0, %c0_i32, %arg1 : i32, i32, i32
  }
  func.func @transform_2(%arg0: i32, %arg1: i32) -> (i32, i32, i32) {
    %c0_i32 = arith.constant 0 : i32
    %c0_i32_0 = arith.constant 0 : i32
    return %arg0, %c0_i32, %arg1 : i32, i32, i32
  }
}

module attributes {stable_mosaic.version = 11 : i64} {
  func.func @_conv_matmul_kernel(%arg0: i32, %arg1: i32, %arg2: memref<8x72xbf16, #tpu.memory_space<vmem>>, %arg3: memref<1x72x256xbf16, #tpu.memory_space<vmem>>, %arg4: memref<1x8x256xf32, #tpu.memory_space<vmem>>) attributes {dimension_semantics = [#tpu.dimension_semantics<parallel>, #tpu.dimension_semantics<parallel>], iteration_bounds = array<i64: 2, 1>, scalar_prefetch = 0 : i64, scratch_operands = 0 : i64, tpu.core_type = #tpu.core_type<tc>, window_params = [{pipeline_mode = #tpu.pipeline_mode<synchronous>, transform_indices = @transform_0, window_bounds = array<i64: 8, 72>}, {transform_indices = @transform_1, window_bounds = array<i64: 1, 72, 256>}, {transform_indices = @transform_2, window_bounds = array<i64: 1, 8, 256>}]} {
    %c0 = arith.constant 0 : index
    %c0_0 = arith.constant 0 : index
    %0 = vector.load %arg2[%c0, %c0_0] : memref<8x72xbf16, #tpu.memory_space<vmem>>, vector<8x72xbf16>
    %c0_1 = arith.constant 0 : index
    %c0_2 = arith.constant 0 : index
    %c0_3 = arith.constant 0 : index
    %1 = vector.load %arg3[%c0_1, %c0_2, %c0_3] : memref<1x72x256xbf16, #tpu.memory_space<vmem>>, vector<1x72x256xbf16>
    %2 = vector.shape_cast %1 : vector<1x72x256xbf16> to vector<72x256xbf16>
    %cst = arith.constant dense<0.000000e+00> : vector<8x256xf32>
    %3 = tpu.matmul %0, %2, %cst {dimension_numbers = #tpu.dot_dimension_numbers<[1], [0], [0], [1], [0, 0, 1, 1], [], []>} : vector<8x72xbf16>, vector<72x256xbf16>, vector<8x256xf32> -> vector<8x256xf32>
    %cst_4 = arith.constant 0.000000e+00 : f32
    %4 = vector.broadcast %cst_4 : f32 to vector<8x256xf32>
    %5 = arith.maximumf %3, %4 : vector<8x256xf32>
    %c0_5 = arith.constant 0 : index
    %c0_6 = arith.constant 0 : index
    %c0_7 = arith.constant 0 : index
    %6 = vector.load %arg4[%c0_5, %c0_6, %c0_7] : memref<1x8x256xf32, #tpu.memory_space<vmem>>, vector<1x8x256xf32>
    %7 = vector.shape_cast %6 : vector<1x8x256xf32> to vector<8x256xf32>
    %8 = vector.shape_cast %5 : vector<8x256xf32> to vector<1x8x256xf32>
    tpu.vector_store %arg4[%c0_5, %c0_6, %c0_7], %8 {strides = array<i32>} : memref<1x8x256xf32, #tpu.memory_space<vmem>>, vector<1x8x256xf32>,
    return
  }
  func.func @transform_0(%arg0: i32, %arg1: i32) -> (i32, i32) {
    %c0_i32 = arith.constant 0 : i32
    %c0_i32_0 = arith.constant 0 : i32
    %c0_i32_1 = arith.constant 0 : i32
    return %c0_i32, %c0_i32_0 : i32, i32
  }
  func.func @transform_1(%arg0: i32, %arg1: i32) -> (i32, i32, i32) {
    %c0_i32 = arith.constant 0 : i32
    %c0_i32_0 = arith.constant 0 : i32
    return %arg0, %c0_i32, %arg1 : i32, i32, i32
  }
  func.func @transform_2(%arg0: i32, %arg1: i32) -> (i32, i32, i32) {
    %c0_i32 = arith.constant 0 : i32
    %c0_i32_0 = arith.constant 0 : i32
    return %arg0, %c0_i32, %arg1 : i32, i32, i32
  }
}

module attributes {stable_mosaic.version = 11 : i64} {
  func.func @_conv_matmul_kernel(%arg0: i32, %arg1: i32, %arg2: memref<8x72xbf16, #tpu.memory_space<vmem>>, %arg3: memref<1x72x256xbf16, #tpu.memory_space<vmem>>, %arg4: memref<1x8x256xf32, #tpu.memory_space<vmem>>) attributes {dimension_semantics = [#tpu.dimension_semantics<parallel>, #tpu.dimension_semantics<parallel>], iteration_bounds = array<i64: 2, 1>, scalar_prefetch = 0 : i64, scratch_operands = 0 : i64, tpu.core_type = #tpu.core_type<tc>, window_params = [{pipeline_mode = #tpu.pipeline_mode<synchronous>, transform_indices = @transform_0, window_bounds = array<i64: 8, 72>}, {transform_indices = @transform_1, window_bounds = array<i64: 1, 72, 256>}, {transform_indices = @transform_2, window_bounds = array<i64: 1, 8, 256>}]} {
    %c0 = arith.constant 0 : index
    %c0_0 = arith.constant 0 : index
    %0 = vector.load %arg2[%c0, %c0_0] : memref<8x72xbf16, #tpu.memory_space<vmem>>, vector<8x72xbf16>
    %c0_1 = arith.constant 0 : index
    %c0_2 = arith.constant 0 : index
    %c0_3 = arith.constant 0 : index
    %1 = vector.load %arg3[%c0_1, %c0_2, %c0_3] : memref<1x72x256xbf16, #tpu.memory_space<vmem>>, vector<1x72x256xbf16>
    %2 = vector.shape_cast %1 : vector<1x72x256xbf16> to vector<72x256xbf16>
    %cst = arith.constant dense<0.000000e+00> : vector<8x256xf32>
    %3 = tpu.matmul %0, %2, %cst {dimension_numbers = #tpu.dot_dimension_numbers<[1], [0], [0], [1], [0, 0, 1, 1], [], []>} : vector<8x72xbf16>, vector<72x256xbf16>, vector<8x256xf32> -> vector<8x256xf32>
    %c0_4 = arith.constant 0 : index
    %c0_5 = arith.constant 0 : index
    %c0_6 = arith.constant 0 : index
    %4 = vector.load %arg4[%c0_4, %c0_5, %c0_6] : memref<1x8x256xf32, #tpu.memory_space<vmem>>, vector<1x8x256xf32>
    %5 = vector.shape_cast %4 : vector<1x8x256xf32> to vector<8x256xf32>
    %6 = vector.shape_cast %3 : vector<8x256xf32> to vector<1x8x256xf32>
    tpu.vector_store %arg4[%c0_4, %c0_5, %c0_6], %6 {strides = array<i32>} : memref<1x8x256xf32, #tpu.memory_space<vmem>>, vector<1x8x256xf32>,
    return
  }
  func.func @transform_0(%arg0: i32, %arg1: i32) -> (i32, i32) {
    %c0_i32 = arith.constant 0 : i32
    %c0_i32_0 = arith.constant 0 : i32
    %c0_i32_1 = arith.constant 0 : i32
    return %c0_i32, %c0_i32_0 : i32, i32
  }
  func.func @transform_1(%arg0: i32, %arg1: i32) -> (i32, i32, i32) {
    %c0_i32 = arith.constant 0 : i32
    %c0_i32_0 = arith.constant 0 : i32
    return %arg0, %c0_i32, %arg1 : i32, i32, i32
  }
  func.func @transform_2(%arg0: i32, %arg1: i32) -> (i32, i32, i32) {
    %c0_i32 = arith.constant 0 : i32
    %c0_i32_0 = arith.constant 0 : i32
    return %arg0, %c0_i32, %arg1 : i32, i32, i32
  }
}

module attributes {stable_mosaic.version = 11 : i64} {
  func.func @_conv_matmul_kernel(%arg0: i32, %arg1: i32, %arg2: memref<1x72xbf16, #tpu.memory_space<vmem>>, %arg3: memref<1x72x256xbf16, #tpu.memory_space<vmem>>, %arg4: memref<1x1x256xf32, #tpu.memory_space<vmem>>) attributes {dimension_semantics = [#tpu.dimension_semantics<parallel>, #tpu.dimension_semantics<parallel>], iteration_bounds = array<i64: 2, 1>, scalar_prefetch = 0 : i64, scratch_operands = 0 : i64, tpu.core_type = #tpu.core_type<tc>, window_params = [{pipeline_mode = #tpu.pipeline_mode<synchronous>, transform_indices = @transform_0, window_bounds = array<i64: 1, 72>}, {transform_indices = @transform_1, window_bounds = array<i64: 1, 72, 256>}, {transform_indices = @transform_2, window_bounds = array<i64: 1, 1, 256>}]} {
    %c0 = arith.constant 0 : index
    %c0_0 = arith.constant 0 : index
    %0 = vector.load %arg2[%c0, %c0_0] : memref<1x72xbf16, #tpu.memory_space<vmem>>, vector<1x72xbf16>
    %c0_1 = arith.constant 0 : index
    %c0_2 = arith.constant 0 : index
    %c0_3 = arith.constant 0 : index
    %1 = vector.load %arg3[%c0_1, %c0_2, %c0_3] : memref<1x72x256xbf16, #tpu.memory_space<vmem>>, vector<1x72x256xbf16>
    %2 = vector.shape_cast %1 : vector<1x72x256xbf16> to vector<72x256xbf16>
    %cst = arith.constant dense<0.000000e+00> : vector<1x256xf32>
    %3 = tpu.matmul %0, %2, %cst {dimension_numbers = #tpu.dot_dimension_numbers<[1], [0], [0], [1], [0, 0, 1, 1], [], []>} : vector<1x72xbf16>, vector<72x256xbf16>, vector<1x256xf32> -> vector<1x256xf32>
    %c0_4 = arith.constant 0 : index
    %c0_5 = arith.constant 0 : index
    %c0_6 = arith.constant 0 : index
    %4 = vector.load %arg4[%c0_4, %c0_5, %c0_6] : memref<1x1x256xf32, #tpu.memory_space<vmem>>, vector<1x1x256xf32>
    %5 = vector.shape_cast %4 : vector<1x1x256xf32> to vector<1x256xf32>
    %6 = vector.shape_cast %3 : vector<1x256xf32> to vector<1x1x256xf32>
    tpu.vector_store %arg4[%c0_4, %c0_5, %c0_6], %6 {strides = array<i32>} : memref<1x1x256xf32, #tpu.memory_space<vmem>>, vector<1x1x256xf32>,
    return
  }
  func.func @transform_0(%arg0: i32, %arg1: i32) -> (i32, i32) {
    %c0_i32 = arith.constant 0 : i32
    %c0_i32_0 = arith.constant 0 : i32
    %c0_i32_1 = arith.constant 0 : i32
    return %c0_i32, %c0_i32_0 : i32, i32
  }
  func.func @transform_1(%arg0: i32, %arg1: i32) -> (i32, i32, i32) {
    %c0_i32 = arith.constant 0 : i32
    %c0_i32_0 = arith.constant 0 : i32
    return %arg0, %c0_i32, %arg1 : i32, i32, i32
  }
  func.func @transform_2(%arg0: i32, %arg1: i32) -> (i32, i32, i32) {
    %c0_i32 = arith.constant 0 : i32
    %c0_i32_0 = arith.constant 0 : i32
    return %arg0, %c0_i32, %arg1 : i32, i32, i32
  }
}

</mosaic_0001>

<bundles_post_ra>
// kernel: closed_call.49
= control target key start
LH: loop header
LB: loop body
LE: loop exit
PB: predicated region body
PF: predicated region fallthrough
CT: control target
= control target key end

     0   :  { %s118_s0 = inlined_call_operand.<no memory space> [shape: f32[1], index: 0, kind: input, shape index: {}]   ;;  %s119_s3 = inlined_call_operand.vmem [shape: f32[4,128], index: 3, kind: input, shape index: {}]   ;;  %s120_s4 = inlined_call_operand.vmem [shape: f32[4,128], index: 4, kind: input, shape index: {}]   ;;  %s121_s5 = inlined_call_operand.vmem [shape: f32[4,128], index: 5, kind: input, shape index: {}]   ;;  %s122_s1 = inlined_call_operand.vmem [shape: f32[4,128], index: 1, kind: input, shape index: {}]   ;;  %s123_s2 = inlined_call_operand.vmem [shape: f32[4,128], index: 2, kind: input, shape index: {}]   ;;  %s124_s6 = inlined_call_operand.vmem [shape: f32[4,128], index: 6, kind: output, shape index: {0}]   ;;  %s125_s7 = inlined_call_operand.vmem [shape: f32[4,128], index: 7, kind: output, shape index: {1}]  }
   0x1   :  { %v27_v0 = vld [vmem:[%s119_s3] sm:$0xf]  ;;  %v28_v1 = vstv %s118_s0 }
   0x2   :  { %v29_v2 = vadd.f32 %v28_v1, %v27_v0  ;;  %v33_v3 = vld [vmem:[%s120_s4] sm:$0xf] }
   0x3   :  { %v39_v4 = vld [vmem:[%s121_s5] sm:$0xf]  ;;  %v34_v5 = vmul.f32 %v33_v3, %v28_v1 }
   0x4   :  { %52 = vrcp.f32 %v29_v2  ;;  %v40_v6 = vmul.f32 %v39_v4, %v28_v1  ;;  %v32_v7 = vld [vmem:[%s122_s1] sm:$0xf] }
   0x5   :  { %v38_v8 = vld [vmem:[%s123_s2] sm:$0xf]  ;;  %v35_v9 = vadd.f32 %v34_v5, %v32_v7 }
   0x6   :  { %v41_v10 = vadd.f32 %v40_v6, %v38_v8 }
   0xe   :  { %v53_v11 = vpop.eup %52 }
   0xf   :  { %v36_v12 = vmul.f32 %v53_v11, %v35_v9  ;;  %v42_v13 = vmul.f32 %v53_v11, %v41_v10 }
  0x11   :  { %37 = vst [vmem:[%s124_s6] sm:$0xf] %v36_v12  ;;  %43 = vst [vmem:[%s125_s7] sm:$0xf] %v42_v13 }

// kernel: closed_call.50
= control target key start
LH: loop header
LB: loop body
LE: loop exit
PB: predicated region body
PF: predicated region fallthrough
CT: control target
= control target key end

     0   :  { %s432_s9 = smov 0   ;;  %s434_s10 = smov 0   ;;  %s468_s0 = inlined_call_operand.vmem [shape: bf16[8,18], index: 0, kind: input, shape index: {}]   ;;  %s469_s1 = inlined_call_operand.vmem [shape: bf16[2,18,256], index: 1, kind: input, shape index: {}]   ;;  %s470_s2 = inlined_call_operand.vmem [shape: f32[2,8,256], index: 2, kind: output, shape index: {}]  }
   0x1   :  { %s436_s11 = smov 0  }
   0x2 LB: > { %s24_s12 = sadd.s32 1, %s410_s10  ;;  %p348_p0 = scmp.ge.s32.totalorder %s414_s11, 1  ;;  %s414_s11 = sphi %s436_s11, %s12_s11   ;;  %s410_s10 = sphi %s434_s10, %s472_s10   ;;  %s406_s9 = sphi %s432_s9, %s471_s9  }
   0x3   : > { %p26_p1 = scmp.ge.s32.totalorder %s24_s12, 2  ;;  %p133_p2 = scmp.lt.s32.totalorder %s414_s11, 3 }
   0x5   : > { %s474_s12 = smov (%p26_p1, %s24_s12), 0  ;;  %p134_p3 = pnand %p348_p0, %p133_p2 }
   0x6   : > { %p164_p4 = scmp.lt.s32.totalorder (!%p134_p3), %s406_s9, 1  ;;  %v416_v0 = vmov (!%p134_p3), 0   ;;  %vm207_vm0 = vcmask (!%p134_p3), 1040384   ;;  %v184_v7 = vld [vmem:[%s468_s0] sm:$0xf] (!%p134_p3)  ;;  %vm203_vm1 = vcmask (!%p134_p3), 146432  }
   0x7   : > { %137 = sbr.rel (%p134_p3) target bundleno = 242 (0xf2), region = 28  ;;  %246 = vmatprep.mubr.bf16.mxu0 (!%p134_p3), %v416_v0 }
   0xe   : > { %s476_s9 = smov (!%p164_p4, %s406_s9), 1 }
   0xf   : > { %s361_s13 = smul.u32 24, %s476_s9  ;;  %s360_s19 = sshll.u32 %s476_s9, 4 }
  0x10   : > { %s181_s22 = scalar_lea.vmem %s470_s2, %s360_s19 }
  0x11   : > { %s171_s16 = scalar_lea.vmem %s469_s1, %s361_s13 }
  0x12   : > { %v187_v1 = vld [vmem:[%s171_s16 + $0x10] sm:$0x11]  ;;  %v387_v2 = vld [vmem:[%s171_s16 + $0x4] ss:$8 sps:$4 sm:$0xff]   ;;  %v390_v4 = vld [vmem:[%s171_s16] ss:$8 sps:$4 sm:$0xff]  }
  0x13   : > { %v355_v3 = vcombine.high %v187_v1, %v187_v1  ;;  %v354_v5 = vcombine.low %v187_v1, %v187_v1  ;;  %214 = vmatprep.subr.bf16.mxu0 %v387_v2 }
  0x14   : > { %215 = vmatpush1.bf16.msra.mxu0 %v390_v4 }
  0x15   : > { %356 = vmatprep.subr.msk.bf16.mxu0 %vm207_vm0, %v355_v3  ;;  %v209_v6 = vsel %vm207_vm0, %v354_v5, 0 }
  0x18   : > { %217 = vmatpush1.bf16.msra.mxu0 %v209_v6 }
  0x1b   : > { %357 = vmatmul.mubr.msk.bf16.vlgmr.msra.gmra.mrb[0].mxu0 %vm203_vm1, %v184_v7 }
  0xee   : > { %v248_v8 = vpop.f32.mrb[0].mxu0 }
  0xef   : > { %255 = vst [vmem:[%s181_s22] sm:$0xff] %v248_v8  ;;  %v250_v9 = vpop.f32.mrb[1].mxu0 }
  0xf0   : > { %256 = vst [vmem:[%s181_s22 + $0x8] sm:$0xff] %v250_v9  ;;  %v252_v10 = vpop.f32.mrb[2].mxu0 }
  0xf1   : > { %v253_v11 = vpop.f32.mrb[3].mxu0 }
  0xf2 PF: > { %s12_s11 = sadd.s32 1, %s414_s11   ;;  %s471_s9 = smov %s410_s10 }
  0xf3   : > { %p9_p5 = scmp.ge.s32.totalorder %s12_s11, 4   ;;  %s472_s10 = smov %s474_s12 }
  0xf5   :  { %11 = sbr.rel (!%p9_p5) target bundleno = 2 (0x2), region = 58 }

// kernel: closed_call.51
= control target key start
LH: loop header
LB: loop body
LE: loop exit
PB: predicated region body
PF: predicated region fallthrough
CT: control target
= control target key end

     0   :  { %s485_s9 = smov 0   ;;  %s487_s10 = smov 0   ;;  %s525_s0 = inlined_call_operand.vmem [shape: bf16[8,72], index: 0, kind: input, shape index: {}]   ;;  %s526_s1 = inlined_call_operand.vmem [shape: bf16[2,72,256], index: 1, kind: input, shape index: {}]   ;;  %s527_s2 = inlined_call_operand.vmem [shape: f32[2,8,256], index: 2, kind: output, shape index: {}]  }
   0x1   :  { %s489_s11 = smov 0  }
   0x2 LB: > { %s24_s12 = sadd.s32 1, %s463_s10  ;;  %p386_p0 = scmp.ge.s32.totalorder %s467_s11, 1  ;;  %s467_s11 = sphi %s489_s11, %s12_s11   ;;  %s463_s10 = sphi %s487_s10, %s529_s10   ;;  %s459_s9 = sphi %s485_s9, %s528_s9  }
   0x3   : > { %p26_p1 = scmp.ge.s32.totalorder %s24_s12, 2  ;;  %p133_p2 = scmp.lt.s32.totalorder %s467_s11, 3 }
   0x5   : > { %s531_s12 = smov (%p26_p1, %s24_s12), 0  ;;  %p134_p3 = pnand %p386_p0, %p133_p2 }
   0x6   : > { %p164_p4 = scmp.lt.s32.totalorder (!%p134_p3), %s459_s9, 1  ;;  %v469_v0 = vmov (!%p134_p3), 0   ;;  %vm243_vm0 = vcmask (!%p134_p3), 1043456   ;;  %v184_v13 = vld [vmem:[%s525_s0] sm:$0xf] (!%p134_p3)  ;;  %vm239_vm1 = vcmask (!%p134_p3), 588800  }
   0x7   : > { %137 = sbr.rel (%p134_p3) target bundleno = 255 (0xff), region = 28  ;;  %282 = vmatprep.mubr.bf16.mxu0 (!%p134_p3), %v469_v0 }
   0xe   : > { %s533_s9 = smov (!%p164_p4, %s459_s9), 1 }
   0xf   : > { %s405_s13 = smul.u32 72, %s533_s9  ;;  %s404_s19 = sshll.u32 %s533_s9, 4 }
  0x10   : > { %s181_s22 = scalar_lea.vmem %s527_s2, %s404_s19 }
  0x11   : > { %s171_s16 = scalar_lea.vmem %s526_s1, %s405_s13 }
  0x12   : > { %v431_v1 = vld [vmem:[%s171_s16 + $0x4] ss:$8 sps:$4 sm:$0xff]   ;;  %v433_v2 = vld [vmem:[%s171_s16] ss:$8 sps:$4 sm:$0xff]   ;;  %v434_v3 = vld [vmem:[%s171_s16 + $0x14] ss:$8 sps:$4 sm:$0xff]  }
  0x13   : > { %250 = vmatprep.subr.bf16.mxu0 %v431_v1  ;;  %v436_v4 = vld [vmem:[%s171_s16 + $0x10] ss:$8 sps:$4 sm:$0xff]   ;;  %v437_v5 = vld [vmem:[%s171_s16 + $0x24] ss:$8 sps:$4 sm:$0xff]   ;;  %v439_v6 = vld [vmem:[%s171_s16 + $0x20] ss:$8 sps:$4 sm:$0xff]  }
  0x14   : > { %251 = vmatpush1.bf16.msra.mxu0 %v433_v2  ;;  %v440_v7 = vld [vmem:[%s171_s16 + $0x34] ss:$8 sps:$4 sm:$0xff]   ;;  %v193_v8 = vld [vmem:[%s171_s16 + $0x40] sm:$0xff]  ;;  %v442_v9 = vld [vmem:[%s171_s16 + $0x30] ss:$8 sps:$4 sm:$0xff]  }
  0x15   : > { %252 = vmatprep.subr.bf16.mxu0 %v434_v3  ;;  %v399_v10 = vcombine.high %v193_v8, %v193_v8  ;;  %v398_v11 = vcombine.low %v193_v8, %v193_v8 }
  0x17   : > { %v245_v12 = vsel %vm243_vm0, %v398_v11, 0 }
  0x18   : > { %253 = vmatpush1.bf16.msra.mxu0 %v436_v4 }
  0x19   : > { %254 = vmatprep.subr.bf16.mxu0 %v437_v5 }
  0x1c   : > { %255 = vmatpush1.bf16.msra.mxu0 %v439_v6 }
  0x1d   : > { %256 = vmatprep.subr.bf16.mxu0 %v440_v7 }
  0x20   : > { %257 = vmatpush1.bf16.msra.mxu0 %v442_v9 }
  0x21   : > { %400 = vmatprep.subr.msk.bf16.mxu0 %vm243_vm0, %v399_v10 }
  0x24   : > { %259 = vmatpush1.bf16.msra.mxu0 %v245_v12 }
  0x27   : > { %401 = vmatmul.mubr.msk.bf16.vlgmr.msra.gmra.mrb[0].mxu0 %vm239_vm1, %v184_v13 }
  0xfa   : > { %v284_v14 = vpop.f32.mrb[0].mxu0 }
  0xfb   : > { %v291_v15 = vmax.f32 %v284_v14, 0.0  ;;  %v286_v16 = vpop.f32.mrb[1].mxu0 }
  0xfc   : > { %v292_v17 = vmax.f32 %v286_v16, 0.0  ;;  %v288_v18 = vpop.f32.mrb[2].mxu0 }
  0xfd   : > { %293 = vst [vmem:[%s181_s22] sm:$0xff] %v291_v15  ;;  %v289_v19 = vpop.f32.mrb[3].mxu0 }
  0xfe   : > { %294 = vst [vmem:[%s181_s22 + $0x8] sm:$0xff] %v292_v17 }
  0xff PF: > { %s12_s11 = sadd.s32 1, %s467_s11   ;;  %s528_s9 = smov %s463_s10 }
 0x100   : > { %p9_p5 = scmp.ge.s32.totalorder %s12_s11, 4   ;;  %s529_s10 = smov %s531_s12 }
 0x102   :  { %11 = sbr.rel (!%p9_p5) target bundleno = 2 (0x2), region = 58 }

// kernel: closed_call.52
= control target key start
LH: loop header
LB: loop body
LE: loop exit
PB: predicated region body
PF: predicated region fallthrough
CT: control target
= control target key end

     0   :  { %s483_s9 = smov 0   ;;  %s485_s10 = smov 0   ;;  %s523_s0 = inlined_call_operand.vmem [shape: bf16[8,72], index: 0, kind: input, shape index: {}]   ;;  %s524_s1 = inlined_call_operand.vmem [shape: bf16[2,72,256], index: 1, kind: input, shape index: {}]   ;;  %s525_s2 = inlined_call_operand.vmem [shape: f32[2,8,256], index: 2, kind: output, shape index: {}]  }
   0x1   :  { %s487_s11 = smov 0  }
   0x2 LB: > { %s24_s12 = sadd.s32 1, %s461_s10  ;;  %p384_p0 = scmp.ge.s32.totalorder %s465_s11, 1  ;;  %s465_s11 = sphi %s487_s11, %s12_s11   ;;  %s461_s10 = sphi %s485_s10, %s527_s10   ;;  %s457_s9 = sphi %s483_s9, %s526_s9  }
   0x3   : > { %p26_p1 = scmp.ge.s32.totalorder %s24_s12, 2  ;;  %p133_p2 = scmp.lt.s32.totalorder %s465_s11, 3 }
   0x5   : > { %s529_s12 = smov (%p26_p1, %s24_s12), 0  ;;  %p134_p3 = pnand %p384_p0, %p133_p2 }
   0x6   : > { %p164_p4 = scmp.lt.s32.totalorder (!%p134_p3), %s457_s9, 1  ;;  %v467_v0 = vmov (!%p134_p3), 0   ;;  %vm243_vm0 = vcmask (!%p134_p3), 1043456   ;;  %v184_v13 = vld [vmem:[%s523_s0] sm:$0xf] (!%p134_p3)  ;;  %vm239_vm1 = vcmask (!%p134_p3), 588800  }
   0x7   : > { %137 = sbr.rel (%p134_p3) target bundleno = 254 (0xfe), region = 28  ;;  %282 = vmatprep.mubr.bf16.mxu0 (!%p134_p3), %v467_v0 }
   0xe   : > { %s531_s9 = smov (!%p164_p4, %s457_s9), 1 }
   0xf   : > { %s403_s13 = smul.u32 72, %s531_s9  ;;  %s402_s19 = sshll.u32 %s531_s9, 4 }
  0x10   : > { %s181_s22 = scalar_lea.vmem %s525_s2, %s402_s19 }
  0x11   : > { %s171_s16 = scalar_lea.vmem %s524_s1, %s403_s13 }
  0x12   : > { %v429_v1 = vld [vmem:[%s171_s16 + $0x4] ss:$8 sps:$4 sm:$0xff]   ;;  %v431_v2 = vld [vmem:[%s171_s16] ss:$8 sps:$4 sm:$0xff]   ;;  %v432_v3 = vld [vmem:[%s171_s16 + $0x14] ss:$8 sps:$4 sm:$0xff]  }
  0x13   : > { %250 = vmatprep.subr.bf16.mxu0 %v429_v1  ;;  %v434_v4 = vld [vmem:[%s171_s16 + $0x10] ss:$8 sps:$4 sm:$0xff]   ;;  %v435_v5 = vld [vmem:[%s171_s16 + $0x24] ss:$8 sps:$4 sm:$0xff]   ;;  %v437_v6 = vld [vmem:[%s171_s16 + $0x20] ss:$8 sps:$4 sm:$0xff]  }
  0x14   : > { %251 = vmatpush1.bf16.msra.mxu0 %v431_v2  ;;  %v438_v7 = vld [vmem:[%s171_s16 + $0x34] ss:$8 sps:$4 sm:$0xff]   ;;  %v193_v8 = vld [vmem:[%s171_s16 + $0x40] sm:$0xff]  ;;  %v440_v9 = vld [vmem:[%s171_s16 + $0x30] ss:$8 sps:$4 sm:$0xff]  }
  0x15   : > { %252 = vmatprep.subr.bf16.mxu0 %v432_v3  ;;  %v397_v10 = vcombine.high %v193_v8, %v193_v8  ;;  %v396_v11 = vcombine.low %v193_v8, %v193_v8 }
  0x17   : > { %v245_v12 = vsel %vm243_vm0, %v396_v11, 0 }
  0x18   : > { %253 = vmatpush1.bf16.msra.mxu0 %v434_v4 }
  0x19   : > { %254 = vmatprep.subr.bf16.mxu0 %v435_v5 }
  0x1c   : > { %255 = vmatpush1.bf16.msra.mxu0 %v437_v6 }
  0x1d   : > { %256 = vmatprep.subr.bf16.mxu0 %v438_v7 }
  0x20   : > { %257 = vmatpush1.bf16.msra.mxu0 %v440_v9 }
  0x21   : > { %398 = vmatprep.subr.msk.bf16.mxu0 %vm243_vm0, %v397_v10 }
  0x24   : > { %259 = vmatpush1.bf16.msra.mxu0 %v245_v12 }
  0x27   : > { %399 = vmatmul.mubr.msk.bf16.vlgmr.msra.gmra.mrb[0].mxu0 %vm239_vm1, %v184_v13 }
  0xfa   : > { %v284_v14 = vpop.f32.mrb[0].mxu0 }
  0xfb   : > { %291 = vst [vmem:[%s181_s22] sm:$0xff] %v284_v14  ;;  %v286_v15 = vpop.f32.mrb[1].mxu0 }
  0xfc   : > { %292 = vst [vmem:[%s181_s22 + $0x8] sm:$0xff] %v286_v15  ;;  %v288_v16 = vpop.f32.mrb[2].mxu0 }
  0xfd   : > { %v289_v17 = vpop.f32.mrb[3].mxu0 }
  0xfe PF: > { %s12_s11 = sadd.s32 1, %s465_s11   ;;  %s526_s9 = smov %s461_s10 }
  0xff   : > { %p9_p5 = scmp.ge.s32.totalorder %s12_s11, 4   ;;  %s527_s10 = smov %s529_s12 }
 0x101   :  { %11 = sbr.rel (!%p9_p5) target bundleno = 2 (0x2), region = 58 }

// kernel: closed_call.55
= control target key start
LH: loop header
LB: loop body
LE: loop exit
PB: predicated region body
PF: predicated region fallthrough
CT: control target
= control target key end

     0   :  { %s496_s9 = smov 0   ;;  %s498_s10 = smov 0   ;;  %s536_s0 = inlined_call_operand.vmem [shape: bf16[1,72], index: 0, kind: input, shape index: {}]   ;;  %s537_s1 = inlined_call_operand.vmem [shape: bf16[2,72,256], index: 1, kind: input, shape index: {}]   ;;  %s538_s2 = inlined_call_operand.vmem [shape: f32[2,1,256], index: 2, kind: output, shape index: {}]  }
   0x1   :  { %s500_s11 = smov 0  }
   0x2 LB: > { %s24_s12 = sadd.s32 1, %s473_s10  ;;  %p397_p0 = scmp.ge.s32.totalorder %s477_s11, 1  ;;  %s477_s11 = sphi %s500_s11, %s12_s11   ;;  %s473_s10 = sphi %s498_s10, %s540_s10   ;;  %s469_s9 = sphi %s496_s9, %s539_s9  }
   0x3   : > { %p26_p1 = scmp.ge.s32.totalorder %s24_s12, 2  ;;  %p133_p2 = scmp.lt.s32.totalorder %s477_s11, 3 }
   0x5   : > { %s542_s12 = smov (%p26_p1, %s24_s12), 0  ;;  %p134_p3 = pnand %p397_p0, %p133_p2 }
   0x6   : > { %p163_p4 = scmp.lt.s32.totalorder (!%p134_p3), %s469_s9, 1  ;;  %v479_v0 = vmov (!%p134_p3), 0   ;;  %vm241_vm0 = vcmask (!%p134_p3), 1043456   ;;  %v182_v13 = vld [vmem:[%s536_s0] sm:$0x1] (!%p134_p3)  ;;  %vm237_vm1 = vcmask (!%p134_p3), 588800   ;;  %v295_v16 = vlaneseq (!%p134_p3) }
   0x7   : > { %137 = sbr.rel (%p134_p3) target bundleno = 259 (0x103), region = 28  ;;  %280 = vmatprep.mubr.bf16.mxu0 (!%p134_p3), %v479_v0  ;;  %v480_v14 = vmov (!%p134_p3), 1966171168  }
   0x8   : > { %v293_v15 = vunpack.c.l.s4 (!%p134_p3), %v480_v14  ;;  %v296_v18 = vshrl.u32 (!%p134_p3), %v295_v16, 7  ;;  %vm309_vm2 = vcmp.lt.s32.totalorder (!%p134_p3), %v295_v16, 256 }
   0xa   : > { %v294_v17 = vunpack.c.0.s8 (!%p134_p3), %v293_v15 }
   0xc   : > { %v297_v20 = vsub.s32 (!%p134_p3), %v294_v17, %v296_v18 }
   0xe   : > { %s544_s9 = smov (!%p163_p4, %s469_s9), 1 }
   0xf   : > { %s414_s13 = smul.u32 72, %s544_s9  ;;  %s399_s19 = sshll.u32 %s544_s9, 1 }
  0x10   : > { %s179_s22 = scalar_lea.vmem %s538_s2, %s399_s19 }
  0x11   : > { %s170_s16 = scalar_lea.vmem %s537_s1, %s414_s13 }
  0x12   : > { %v441_v1 = vld [vmem:[%s170_s16 + $0x4] ss:$8 sps:$4 sm:$0xff]   ;;  %v443_v2 = vld [vmem:[%s170_s16] ss:$8 sps:$4 sm:$0xff]   ;;  %v444_v3 = vld [vmem:[%s170_s16 + $0x14] ss:$8 sps:$4 sm:$0xff]  }
  0x13   : > { %248 = vmatprep.subr.bf16.mxu0 %v441_v1  ;;  %v446_v4 = vld [vmem:[%s170_s16 + $0x10] ss:$8 sps:$4 sm:$0xff]   ;;  %v447_v5 = vld [vmem:[%s170_s16 + $0x24] ss:$8 sps:$4 sm:$0xff]   ;;  %v449_v6 = vld [vmem:[%s170_s16 + $0x20] ss:$8 sps:$4 sm:$0xff]  }
  0x14   : > { %249 = vmatpush1.bf16.msra.mxu0 %v443_v2  ;;  %v450_v7 = vld [vmem:[%s170_s16 + $0x34] ss:$8 sps:$4 sm:$0xff]   ;;  %v191_v8 = vld [vmem:[%s170_s16 + $0x40] sm:$0xff]  ;;  %v452_v9 = vld [vmem:[%s170_s16 + $0x30] ss:$8 sps:$4 sm:$0xff]  }
  0x15   : > { %250 = vmatprep.subr.bf16.mxu0 %v444_v3  ;;  %v409_v10 = vcombine.high %v191_v8, %v191_v8  ;;  %v408_v11 = vcombine.low %v191_v8, %v191_v8 }
  0x17   : > { %v243_v12 = vsel %vm241_vm0, %v408_v11, 0 }
  0x18   : > { %251 = vmatpush1.bf16.msra.mxu0 %v446_v4 }
  0x19   : > { %252 = vmatprep.subr.bf16.mxu0 %v447_v5 }
  0x1c   : > { %253 = vmatpush1.bf16.msra.mxu0 %v449_v6 }
  0x1d   : > { %254 = vmatprep.subr.bf16.mxu0 %v450_v7 }
  0x20   : > { %255 = vmatpush1.bf16.msra.mxu0 %v452_v9 }
  0x21   : > { %410 = vmatprep.subr.msk.bf16.mxu0 %vm241_vm0, %v409_v10 }
  0x24   : > { %257 = vmatpush1.bf16.msra.mxu0 %v243_v12 }
  0x27   : > { %411 = vmatmul.mubr.msk.bf16.vlgmr.msra.gmra.mrb[0].mxu0 %vm237_vm1, %v182_v13 }
  0xfa   : > { %v282_v19 = vpop.f32.mrb[0].mxu0 }
  0xfb   : > { %v284_v21 = vpop.f32.mrb[1].mxu0 }
  0xfc   : > { %v291_v22 = vcombine.low %v282_v19, %v284_v21  ;;  %v286_v23 = vpop.f32.mrb[2].mxu0 }
  0xfd   : > { %v287_v24 = vpop.f32.mrb[3].mxu0 }
  0xfe   : > { %v298_v25 = vrot.slane %v291_v22, %v297_v20 }
 0x100   : > { %v305_v26 = vrot.slane %v298_v25, %v297_v20 }
 0x102   : > { %311 = vst.msk [vmem:[%s179_s22] sm:$0x3] %vm309_vm2, %v305_v26 }
 0x103 PF: > { %s12_s11 = sadd.s32 1, %s477_s11   ;;  %s539_s9 = smov %s473_s10 }
 0x104   : > { %p9_p5 = scmp.ge.s32.totalorder %s12_s11, 4   ;;  %s540_s10 = smov %s542_s12 }
 0x106   :  { %11 = sbr.rel (!%p9_p5) target bundleno = 2 (0x2), region = 58 }

</bundles_post_ra>
